<compile_context>
chip_gen: v5e
topology: v5e:2x2
jax: 0.10.0
libtpu: 0.0.40
codegen_flags: <defaults>
</compile_context>

<pallas_src>
import numpy as np
import jax
import jax.numpy as jnp
from jax.experimental import pallas as pl
from jax.experimental.pallas import tpu as pltpu

LANE = 128
ROW_ALIGN = 32        # int8 packs 4x along sublanes -> keep row counts at x32
MAX_TILE_ROWS = 2048  # 2048 rows * 128 lanes * 4 B = 1 MiB f32 per stream/step


def _round_up(x, m):
    return (x + m - 1) // m * m


def _ranef_kernel(w_i_ref, w_s_ref, seg_ref, x_ref, out_ref):
    """One (biomarker, row-tile) block.

    w_i_ref / w_s_ref : (B, S) f32 in SMEM  (pre-masked per-subject weights)
    seg_ref           : (1, tR, 128) int8   (subject id per measurement, -1 = pad)
    x_ref / out_ref   : (1, tR, 128) f32
    """
    b = pl.program_id(0)
    S = w_i_ref.shape[1]

    seg = seg_ref[...].astype(jnp.int32)
    wi_exp = jnp.zeros(seg.shape, jnp.float32)
    ws_exp = jnp.zeros(seg.shape, jnp.float32)

    # Segments are disjoint, so a select-overwrite per subject suffices (no add).
    # S is small -> static unroll on the VPU; the padded tail (seg == -1) never
    # matches and stays exactly zero.
    # TODO(synk): past S ~ 64 subjects, switch to an in-kernel one-hot + MXU
    # (B,S)@(S,tile) matmul instead of this O(S) select chain.
    for s in range(S):
        m = seg == s
        wi_exp = jnp.where(m, w_i_ref[b, s], wi_exp)
        ws_exp = jnp.where(m, w_s_ref[b, s], ws_exp)

    out_ref[...] = x_ref[...] * ws_exp + wi_exp


def random_effects_forward(w_i, w_s, seg, xcat):
    """w_i/w_s: (B,S) f32; seg: (B,Rp,128) int8; xcat: (B,Rp,128) f32."""
    B, S = w_i.shape
    _, Rp, lane = xcat.shape
    assert lane == LANE and seg.shape == (B, Rp, LANE)
    t_rows = min(Rp, MAX_TILE_ROWS)
    assert Rp % t_rows == 0 and t_rows % ROW_ALIGN == 0
    n_r = Rp // t_rows

    smem_spec = pl.BlockSpec(memory_space=pltpu.MemorySpace.SMEM)
    tile_map = lambda b, r: (b, r, 0)
    tile_spec = pl.BlockSpec((1, t_rows, LANE), tile_map)

    return pl.pallas_call(
        _ranef_kernel,
        out_shape=jax.ShapeDtypeStruct((B, Rp, LANE), jnp.float32),
        grid_spec=pltpu.PrefetchScalarGridSpec(
            num_scalar_prefetch=0,
            grid=(B, n_r),
            in_specs=[smem_spec, smem_spec, tile_spec, tile_spec],
            out_specs=tile_spec,
        ),
        compiler_params=pltpu.CompilerParams(
            dimension_semantics=("parallel", "parallel"),
            vmem_limit_bytes=32 * 1024 * 1024),
    )(w_i, w_s, seg, xcat)


def build_inputs(x_per_biom, list_id, ranef_inter, ranef_slope, samp_i, samp_s):
    """Builds the padded, lane-dense kernel inputs from module-style data."""
    B = len(x_per_biom)
    S = len(list_id)
    assert S <= 127, "segment ids must fit int8 (-1 reserved for padding)"
    T_list = [int(sum(len(v) for v in xb)) for xb in x_per_biom]

    rows = _round_up(max(1, -(-max(T_list) // LANE)), ROW_ALIGN)
    t_rows = min(rows, MAX_TILE_ROWS)
    Rp = _round_up(rows, t_rows)
    Tp = Rp * LANE

    xcat = np.zeros((B, Tp), np.float32)
    seg = np.full((B, Tp), -1, np.int8)
    for b, xb in enumerate(x_per_biom):
        off = 0
        for s, meas in enumerate(xb):
            n = len(meas)
            xcat[b, off:off + n] = np.asarray(meas, np.float32)
            seg[b, off:off + n] = s
            off += n

    # per-subject random-effect weights; >2 / >5 qualification folded in here
    ri = np.asarray(ranef_inter, np.float32)[:, list_id]          # (B, S)
    rs = np.asarray(ranef_slope, np.float32)[:, list_id]
    len_meas = np.array([[len(x_per_biom[b][s]) for s in range(S)]
                         for b in range(B)])
    w_i = (np.asarray(samp_i, np.float32) * np.exp(ri) * (len_meas > 2)).astype(np.float32)
    w_s = (np.asarray(samp_s, np.float32) * np.exp(rs) * (len_meas > 5)).astype(np.float32)

    return (jnp.asarray(w_i), jnp.asarray(w_s),
            jnp.asarray(seg.reshape(B, Rp, LANE)),
            jnp.asarray(xcat.reshape(B, Rp, LANE)),
            T_list)


if __name__ == "__main__":
    key = jax.random.PRNGKey(0)

    N_subjects = 10
    B = 3                                        # N_biomarkers
    list_id = np.array([0, 2, 3, 5, 7, 9], dtype=np.int64)
    S = len(list_id)

    # per-biomarker measurement layouts (they may differ, as in the PyTorch module)
    len_meas_per_biom = [[1, 3, 6, 4, 7, 2],
                         [2, 4, 1, 6, 3, 7],
                         [3, 3, 3, 8, 2, 5]]

    # parameters: Tensor(N_biomarkers, N_subjects).fill_(-2)
    ranef_inter = np.full((B, N_subjects), -2.0, np.float32)
    ranef_slope = np.full((B, N_subjects), -2.0, np.float32)

    # samplers: torch.randn(1, len(x[0])) drawn per biomarker (done host-side here)
    key, k1, k2, k3 = jax.random.split(key, 4)
    samp_i = jax.random.normal(k1, (B, S), dtype=jnp.float32)
    samp_s = jax.random.normal(k2, (B, S), dtype=jnp.float32)

    # x[biom][subject] measurement vectors
    x_list = []
    kx = k3
    for b in range(B):
        kx, kb = jax.random.split(kx)
        T_b = int(sum(len_meas_per_biom[b]))
        vec = np.asarray(jax.random.normal(kb, (T_b,), dtype=jnp.float32))
        offs = np.concatenate([[0], np.cumsum(len_meas_per_biom[b])]).astype(int)
        x_list.append([vec[offs[s]:offs[s + 1]] for s in range(S)])

    w_i, w_s, seg, xcat, T_list = build_inputs(
        x_list, list_id, ranef_inter, ranef_slope, samp_i, samp_s)

    out = random_effects_forward(w_i, w_s, seg, xcat)
    out = jax.block_until_ready(out)
    out_flat = np.asarray(out).reshape(B, -1)

    # module output: list of per-biomarker (T_b, 1) arrays
    output_x = [out_flat[b, :T_list[b]].reshape(T_list[b], 1) for b in range(B)]

    # pure-numpy reference using the dense indicator matrices (like the module)
    samp_i_np = np.asarray(samp_i)
    samp_s_np = np.asarray(samp_s)
    for b in range(B):
        len_b = len_meas_per_biom[b]
        T_b = int(sum(len_b))
        mat_i = np.zeros((S, T_b), np.float32)
        mat_s = np.zeros((S, T_b), np.float32)
        off = 0
        for s in range(S):
            if len_b[s] > 2:
                mat_i[s, off:off + len_b[s]] = 1.0
            if len_b[s] > 5:
                mat_s[s, off:off + len_b[s]] = 1.0
            off += len_b[s]
        wi_b = samp_i_np[b] * np.exp(ranef_inter[b, list_id])
        ws_b = samp_s_np[b] * np.exp(ranef_slope[b, list_id])
        xcat_b = np.concatenate([np.asarray(v, np.float32) for v in x_list[b]])
        ref_b = xcat_b * (ws_b @ mat_s) + (wi_b @ mat_i)
        assert np.allclose(output_x[b].ravel(), ref_b, rtol=1e-5, atol=1e-5), b
        # padded tail must be exactly zero (seg = -1, xcat padding = 0)
        assert np.all(out_flat[b, T_list[b]:] == 0.0), b

    assert output_x[0].shape == (T_list[0], 1)
    print("KERNEL_OK")
</pallas_src>

<mosaic_0001>
module attributes {stable_mosaic.version = 11 : i64} {
  func.func @_ranef_kernel(%arg0: i32, %arg1: i32, %arg2: memref<3x6xf32, #tpu.memory_space<smem>>, %arg3: memref<3x6xf32, #tpu.memory_space<smem>>, %arg4: memref<1x32x128xi8, #tpu.memory_space<vmem>>, %arg5: memref<1x32x128xf32, #tpu.memory_space<vmem>>, %arg6: memref<1x32x128xf32, #tpu.memory_space<vmem>>) attributes {dimension_semantics = [#tpu.dimension_semantics<parallel>, #tpu.dimension_semantics<parallel>], iteration_bounds = array<i64: 3, 1>, scalar_prefetch = 0 : i64, scratch_operands = 0 : i64, tpu.core_type = #tpu.core_type<tc>, window_params = [{transform_indices = @transform_0, window_bounds = array<i64: 3, 6>}, {transform_indices = @transform_1, window_bounds = array<i64: 3, 6>}, {transform_indices = @transform_2, window_bounds = array<i64: 1, 32, 128>}, {transform_indices = @transform_3, window_bounds = array<i64: 1, 32, 128>}, {transform_indices = @transform_4, window_bounds = array<i64: 1, 32, 128>}]} {
    %c0 = arith.constant 0 : index
    %c0_0 = arith.constant 0 : index
    %c0_1 = arith.constant 0 : index
    %0 = vector.load %arg4[%c0, %c0_0, %c0_1] : memref<1x32x128xi8, #tpu.memory_space<vmem>>, vector<1x32x128xi8>
    %1 = arith.extsi %0 : vector<1x32x128xi8> to vector<1x32x128xi32>
    %cst = arith.constant 0.000000e+00 : f32
    %2 = vector.broadcast %cst : f32 to vector<1x32x128xf32>
    %cst_2 = arith.constant 0.000000e+00 : f32
    %3 = vector.broadcast %cst_2 : f32 to vector<1x32x128xf32>
    %c0_i32 = arith.constant 0 : i32
    %4 = vector.broadcast %c0_i32 : i32 to vector<1x32x128xi32>
    %5 = arith.cmpi eq, %1, %4 : vector<1x32x128xi32>
    %6 = arith.index_cast %arg0 : i32 to index
    %c0_3 = arith.constant 0 : index
    %7 = memref.load %arg2[%6, %c0_3] : memref<3x6xf32, #tpu.memory_space<smem>>
    %8 = vector.broadcast %7 : f32 to vector<1x32x128xf32>
    %9 = arith.select %5, %8, %2 : vector<1x32x128xi1>, vector<1x32x128xf32>
    %10 = arith.index_cast %arg0 : i32 to index
    %c0_4 = arith.constant 0 : index
    %11 = memref.load %arg3[%10, %c0_4] : memref<3x6xf32, #tpu.memory_space<smem>>
    %12 = vector.broadcast %11 : f32 to vector<1x32x128xf32>
    %13 = arith.select %5, %12, %3 : vector<1x32x128xi1>, vector<1x32x128xf32>
    %c1_i32 = arith.constant 1 : i32
    %14 = vector.broadcast %c1_i32 : i32 to vector<1x32x128xi32>
    %15 = arith.cmpi eq, %1, %14 : vector<1x32x128xi32>
    %16 = arith.index_cast %arg0 : i32 to index
    %c1 = arith.constant 1 : index
    %17 = memref.load %arg2[%16, %c1] : memref<3x6xf32, #tpu.memory_space<smem>>
    %18 = vector.broadcast %17 : f32 to vector<1x32x128xf32>
    %19 = arith.select %15, %18, %9 : vector<1x32x128xi1>, vector<1x32x128xf32>
    %20 = arith.index_cast %arg0 : i32 to index
    %c1_5 = arith.constant 1 : index
    %21 = memref.load %arg3[%20, %c1_5] : memref<3x6xf32, #tpu.memory_space<smem>>
    %22 = vector.broadcast %21 : f32 to vector<1x32x128xf32>
    %23 = arith.select %15, %22, %13 : vector<1x32x128xi1>, vector<1x32x128xf32>
    %c2_i32 = arith.constant 2 : i32
    %24 = vector.broadcast %c2_i32 : i32 to vector<1x32x128xi32>
    %25 = arith.cmpi eq, %1, %24 : vector<1x32x128xi32>
    %26 = arith.index_cast %arg0 : i32 to index
    %c2 = arith.constant 2 : index
    %27 = memref.load %arg2[%26, %c2] : memref<3x6xf32, #tpu.memory_space<smem>>
    %28 = vector.broadcast %27 : f32 to vector<1x32x128xf32>
    %29 = arith.select %25, %28, %19 : vector<1x32x128xi1>, vector<1x32x128xf32>
    %30 = arith.index_cast %arg0 : i32 to index
    %c2_6 = arith.constant 2 : index
    %31 = memref.load %arg3[%30, %c2_6] : memref<3x6xf32, #tpu.memory_space<smem>>
    %32 = vector.broadcast %31 : f32 to vector<1x32x128xf32>
    %33 = arith.select %25, %32, %23 : vector<1x32x128xi1>, vector<1x32x128xf32>
    %c3_i32 = arith.constant 3 : i32
    %34 = vector.broadcast %c3_i32 : i32 to vector<1x32x128xi32>
    %35 = arith.cmpi eq, %1, %34 : vector<1x32x128xi32>
    %36 = arith.index_cast %arg0 : i32 to index
    %c3 = arith.constant 3 : index
    %37 = memref.load %arg2[%36, %c3] : memref<3x6xf32, #tpu.memory_space<smem>>
    %38 = vector.broadcast %37 : f32 to vector<1x32x128xf32>
    %39 = arith.select %35, %38, %29 : vector<1x32x128xi1>, vector<1x32x128xf32>
    %40 = arith.index_cast %arg0 : i32 to index
    %c3_7 = arith.constant 3 : index
    %41 = memref.load %arg3[%40, %c3_7] : memref<3x6xf32, #tpu.memory_space<smem>>
    %42 = vector.broadcast %41 : f32 to vector<1x32x128xf32>
    %43 = arith.select %35, %42, %33 : vector<1x32x128xi1>, vector<1x32x128xf32>
    %c4_i32 = arith.constant 4 : i32
    %44 = vector.broadcast %c4_i32 : i32 to vector<1x32x128xi32>
    %45 = arith.cmpi eq, %1, %44 : vector<1x32x128xi32>
    %46 = arith.index_cast %arg0 : i32 to index
    %c4 = arith.constant 4 : index
    %47 = memref.load %arg2[%46, %c4] : memref<3x6xf32, #tpu.memory_space<smem>>
    %48 = vector.broadcast %47 : f32 to vector<1x32x128xf32>
    %49 = arith.select %45, %48, %39 : vector<1x32x128xi1>, vector<1x32x128xf32>
    %50 = arith.index_cast %arg0 : i32 to index
    %c4_8 = arith.constant 4 : index
    %51 = memref.load %arg3[%50, %c4_8] : memref<3x6xf32, #tpu.memory_space<smem>>
    %52 = vector.broadcast %51 : f32 to vector<1x32x128xf32>
    %53 = arith.select %45, %52, %43 : vector<1x32x128xi1>, vector<1x32x128xf32>
    %c5_i32 = arith.constant 5 : i32
    %54 = vector.broadcast %c5_i32 : i32 to vector<1x32x128xi32>
    %55 = arith.cmpi eq, %1, %54 : vector<1x32x128xi32>
    %56 = arith.index_cast %arg0 : i32 to index
    %c5 = arith.constant 5 : index
    %57 = memref.load %arg2[%56, %c5] : memref<3x6xf32, #tpu.memory_space<smem>>
    %58 = vector.broadcast %57 : f32 to vector<1x32x128xf32>
    %59 = arith.select %55, %58, %49 : vector<1x32x128xi1>, vector<1x32x128xf32>
    %60 = arith.index_cast %arg0 : i32 to index
    %c5_9 = arith.constant 5 : index
    %61 = memref.load %arg3[%60, %c5_9] : memref<3x6xf32, #tpu.memory_space<smem>>
    %62 = vector.broadcast %61 : f32 to vector<1x32x128xf32>
    %63 = arith.select %55, %62, %53 : vector<1x32x128xi1>, vector<1x32x128xf32>
    %c0_10 = arith.constant 0 : index
    %c0_11 = arith.constant 0 : index
    %c0_12 = arith.constant 0 : index
    %64 = vector.load %arg5[%c0_10, %c0_11, %c0_12] : memref<1x32x128xf32, #tpu.memory_space<vmem>>, vector<1x32x128xf32>
    %65 = arith.mulf %64, %63 : vector<1x32x128xf32>
    %66 = arith.addf %65, %59 : vector<1x32x128xf32>
    %c0_13 = arith.constant 0 : index
    %c0_14 = arith.constant 0 : index
    %c0_15 = arith.constant 0 : index
    %67 = vector.load %arg6[%c0_13, %c0_14, %c0_15] : memref<1x32x128xf32, #tpu.memory_space<vmem>>, vector<1x32x128xf32>
    tpu.vector_store %arg6[%c0_13, %c0_14, %c0_15], %66 {strides = array<i32>} : memref<1x32x128xf32, #tpu.memory_space<vmem>>, vector<1x32x128xf32>,
    return
  }
  func.func @transform_0(%arg0: i32, %arg1: i32) -> (i32, i32) {
    %c0_i32 = arith.constant 0 : i32
    %c0_i32_0 = arith.constant 0 : i32
    %c0_i32_1 = arith.constant 0 : i32
    return %c0_i32, %c0_i32_0 : i32, i32
  }
  func.func @transform_1(%arg0: i32, %arg1: i32) -> (i32, i32) {
    %c0_i32 = arith.constant 0 : i32
    %c0_i32_0 = arith.constant 0 : i32
    %c0_i32_1 = arith.constant 0 : i32
    return %c0_i32, %c0_i32_0 : i32, i32
  }
  func.func @transform_2(%arg0: i32, %arg1: i32) -> (i32, i32, i32) {
    %c0_i32 = arith.constant 0 : i32
    %c0_i32_0 = arith.constant 0 : i32
    return %arg0, %arg1, %c0_i32 : i32, i32, i32
  }
  func.func @transform_3(%arg0: i32, %arg1: i32) -> (i32, i32, i32) {
    %c0_i32 = arith.constant 0 : i32
    %c0_i32_0 = arith.constant 0 : i32
    return %arg0, %arg1, %c0_i32 : i32, i32, i32
  }
  func.func @transform_4(%arg0: i32, %arg1: i32) -> (i32, i32, i32) {
    %c0_i32 = arith.constant 0 : i32
    %c0_i32_0 = arith.constant 0 : i32
    return %arg0, %arg1, %c0_i32 : i32, i32, i32
  }
}

</mosaic_0001>

<bundles_post_ra>
// kernel: tpu_custom_call.1
= control target key start
LH: loop header
LB: loop body
LE: loop exit
PB: predicated region body
PF: predicated region fallthrough
CT: control target
= control target key end

     0   :  { %s1263_s0 = inlined_call_operand.hbm [shape: f32[3,6], index: 0, kind: input, shape index: {}]   ;;  %s1264_s1 = inlined_call_operand.hbm [shape: f32[3,6], index: 1, kind: input, shape index: {}]   ;;  %s1265_s2 = inlined_call_operand.hbm [shape: s8[3,32,128], index: 2, kind: input, shape index: {}]   ;;  %s1266_s3 = inlined_call_operand.hbm [shape: f32[3,32,128], index: 3, kind: input, shape index: {}]   ;;  %s1267_s4 = inlined_call_operand.hbm [shape: f32[3,32,128], index: 4, kind: output, shape index: {}]  }
   0x1   :  { %1268 = sst [smem:[#allocation17_spill]] %s1263_s0 }
   0x2   :  { %1269 = sst [smem:[#allocation18_spill]] %s1264_s1 }
   0x3   :  { %1270 = sst [smem:[#allocation19_spill]] %s1265_s2 }
   0x4   :  { %9 = vsyncpa [#allocation5], 0 }
   0x5   :  { %10 = vsyncpa [#allocation7], 0 }
   0x6   :  { %11 = vsyncpa [#allocation3], 0 }
   0x7   :  { %13 = vsyncpa [#allocation3 + $0x1], 0 }
   0x8   :  { %14 = vsyncpa [#allocation10], 0 }
   0x9   :  { %16 = vsyncpa [#allocation10 + $0x1], 0 }
   0xa   :  { %17 = vsyncpa [#allocation4], 0 }
   0xb   :  { %19 = vsyncpa [#allocation4 + $0x1], 0  ;;  %s915_s15 = smov 0   ;;  %s917_s16 = smov 0  }
   0xc   :  { %s919_s17 = smov 0   ;;  %s921_s18 = smov 0  }
   0xd   :  { %s923_s19 = smov 0   ;;  %s925_s20 = smov 0  }
   0xe LB: > { %s581_s21 = sadd.s32 4294967295, %s882_s20   ;;  %s582_s22 = sadd.s32 4294967294, %s882_s20   ;;  %s882_s20 = sphi %s925_s20, %s25_s20   ;;  %s878_s19 = sphi %s923_s19, %s1292_s19   ;;  %s874_s18 = sphi %s921_s18, %s1291_s18   ;;  %s870_s17 = sphi %s919_s17, %s1290_s17   ;;  %s866_s16 = sphi %s917_s16, %s1289_s16   ;;  %s862_s15 = sphi %s915_s15, %s1288_s15  }
   0xf   : > { %p101_p0 = scmp.ne.s32.totalorder %s866_s16, %s862_s15  ;;  %p949_p1 = scmp.eq.s32.totalorder %s581_s21, 0 }
  0x10   : > { %p953_p2 = scmp.eq.s32.totalorder %s581_s21, 2  ;;  %p161_p3 = scmp.eq.s32.totalorder %s582_s22, 2 }
  0x11   : > { %p959_p4 = por %p949_p1, %p101_p0  ;;  %p583_p5 = scmp.ge.s32.totalorder %s882_s20, 1 }
  0x12   : > { %p964_p6 = por %p161_p3, %p101_p0  ;;  %p168_p7 = scmp.lt.s32.totalorder %s882_s20, 4 }
  0x13   : > { %s1275_s0 = sld [smem:[#allocation17_spill]]  ;;  %s884_s8 = smov [#allocation2]  }
  0x14   : > { %p972_p8 = pnand %p583_p5, %p168_p7  ;;  %s1277_s1 = sld [smem:[#allocation18_spill]] }
  0x15   : > { %s885_s9 = smov [#allocation6]   ;;  %s37_s10 = sadd.s32 1, %s878_s19 }
  0x16   : > { %p620_p9 = pneg %p972_p8  ;;  %s88_s11 = sadd.s32 1, %s870_s17 }
  0x17   : > { %p39_p11 = scmp.ge.s32.totalorder %s37_s10, 3  ;;  %p95_p12 = scmp.ne.s32.totalorder %s870_s17, %s866_s16 }
  0x18   : > { %p621_p10 = pnand %p620_p9, %p949_p1  ;;  %p96_p13 = scmp.eq.s32.totalorder %s882_s20, 0 }
  0x19   : > { %s180_s29 = sshll.u32 %s1275_s0, 4  ;;  %p640_p0 = scmp.lt.s32.totalorder %s882_s20, 3  ;;  %s181_s29 = int_to_ptr.hbm [resolvable:$true] %s180_s29 }
  0x1a   : > { %s190_s7 = sshll.u32 %s1277_s1, 4  ;;  %s1294_s10 = smov (%p39_p11, %s37_s10), 0  ;;  %s191_s7 = int_to_ptr.hbm [resolvable:$true] %s190_s7 }
  0x1b   : > { %623 = dma.hbm_to_smem (!%p621_p10), %s181_s29, 64, %s884_s8, [#allocation5]  }
  0x1c   : > { %626 = dma.hbm_to_smem (!%p621_p10), %s191_s7, 64, %s885_s9, [#allocation7]  }
  0x1d   : > { %p991_p3 = por %p96_p13, %p95_p12  ;;  %p997_p5 = por %p953_p2, %p95_p12 }
  0x1e   : > { %s83_s14 = ssub.s32 %s878_s19, %s1294_s10  ;;  %s1004_s21 = sand.u32 1, %s870_s17  }
  0x1f   : > { %p86_p7 = scmp.eq.s32.totalorder %s83_s14, 0  ;;  %s587_s22 = sshll.u32 %s1004_s21, 3 }
  0x20   : > { %s588_s27 = sshll.u32 %s878_s19, 3  ;;  %s1280_s2 = sld [smem:[#allocation19_spill]] }
  0x21   : > { %s1009_s28 = scalar_select %p86_p7, %s870_s17, %s88_s11  }
  0x22   : > { %s205_s7 = scalar_lea.vmem [#allocation8], %s587_s22  ;;  %p1018_p2 = pnand %p640_p0, %p991_p3 }
  0x23   : > { %s214_s8 = sshll.u32 %s205_s7, 4  ;;  %s589_s11 = sshll.u32 %s1004_s21, 5  ;;  %s215_s8 = int_to_ptr.vmem [resolvable:$true] %s214_s8 }
  0x24   : > { %s604_s14 = sshll.u32 %s878_s19, 5  ;;  %s202_s0 = scalar_lea.sflag [#allocation3], %s1004_s21 }
  0x25   : > { %s232_s22 = scalar_lea.hbm %s1266_s3, %s604_s14  ;;  %s225_s5 = scalar_lea.vmem [#allocation9], %s589_s11 }
  0x26   : > { %s210_s24 = scalar_lea.hbm %s1280_s2, %s588_s27  ;;  %s233_s7 = sshll.u32 %s232_s22, 4  ;;  %s234_s7 = int_to_ptr.hbm [resolvable:$true] %s233_s7 }
  0x27   : > { %s212_s6 = sshll.u32 %s210_s24, 4  ;;  %s235_s24 = sshll.u32 %s225_s5, 4  ;;  %s213_s6 = int_to_ptr.hbm [resolvable:$true] %s212_s6  ;;  %s236_s24 = int_to_ptr.vmem [resolvable:$true] %s235_s24 }
  0x28   : > { %630 = dma.hbm_to_vmem [thread:$0]  (!%p1018_p2), %s213_s6, 128, %s215_s8, %s202_s0  }
  0x29   : > { %s222_s12 = scalar_lea.sflag [#allocation10], %s1004_s21  ;;  %s886_s1 = smov 128  }
  0x2a   : > { %s887_s2 = smov 8   ;;  %247 = sbr.rel (%p972_p8) target bundleno = 95 (0x5f), region = 36 }
  0x2b   : > { %633 = dma.hbm_to_vmem [thread:$0]  (!%p1018_p2), %s234_s7, 512, %s236_s24, %s222_s12, %s886_s1, %s886_s1, %s887_s2  }
  0x2f   : > { %841 = dma.done.wait (%p949_p1), [#allocation5], 64  }
  0x30   : > { %843 = vsyncadd (%p949_p1), [#allocation5], 4294967232 }
  0x31   : > { %845 = dma.done.wait (%p949_p1), [#allocation7], 64  }
  0x32   : > { %847 = vsyncadd (%p949_p1), [#allocation7], 4294967232  ;;  %s1044_s0 = sand.u32 1, %s866_s16  }
  0x33   : > { %s595_s1 = sshll.u32 %s1044_s0, 3  ;;  %s260_s2 = scalar_lea.sflag [#allocation3], %s1044_s0 }
  0x34   : > { %s263_s30 = scalar_lea.vmem [#allocation8], %s595_s1 }
  0x35   : > { %849 = dma.done.wait (%p959_p4), %s260_s2, 128  }
  0x36   : > { %851 = vsyncadd (%p959_p4), %s260_s2, 4294967168  ;;  %s596_s23 = sshll.u32 %s1044_s0, 5  ;;  %s270_s21 = scalar_lea.sflag [#allocation10], %s1044_s0 }
  0x37   : > { %s1056_s6 = scalar_lea.vmem [#allocation9], %s596_s23 }
  0x38   : > { %853 = dma.done.wait (%p959_p4), %s270_s21, 512  }
  0x39   : > { %855 = vsyncadd (%p959_p4), %s270_s21, 4294966784 }
  0x3a   : > { %279 = sfence }
  0x3b   : > { %v307_v0 = vld [vmem:[%s263_s30] sm:$0xff]  ;;  %s1063_s8 = sshll.u32 %s874_s18, 7  ;;  %v414_v44 = vld [vmem:[%s1056_s6] sm:$0xff]  ;;  %v415_v46 = vld [vmem:[%s1056_s6 + $0x8] sm:$0xff] }
  0x3c   : > { %v1065_v1 = vunpack.c.0.s8 %v307_v0  ;;  %s317_s9 = sld [smem:[#allocation2 + %s1063_s8]]  ;;  %s333_s11 = sadd.s32 1, %s1063_s8  ;;  %v1069_v2 = vunpack.c.1.s8 %v307_v0  ;;  %v1072_v3 = vunpack.c.2.s8 %v307_v0  ;;  %v1082_v4 = vunpack.c.3.s8 %v307_v0  ;;  %v416_v48 = vld [vmem:[%s1056_s6 + $0x10] sm:$0xff] }
  0x3d   : > { %s323_s14 = sld [smem:[#allocation6 + %s1063_s8]]  ;;  %s350_s27 = sadd.s32 2, %s1063_s8 }
  0x3e   : > { %s1074_s25 = sld [smem:[#allocation2 + %s333_s11]]  ;;  %vm312_vm0 = vcmp.eq.s32.totalorder %v1065_v1, 0  ;;  %vm329_vm1 = vcmp.eq.s32.totalorder %v1065_v1, 1  ;;  %vm346_vm2 = vcmp.eq.s32.totalorder %v1065_v1, 2  ;;  %vm363_vm3 = vcmp.eq.s32.totalorder %v1065_v1, 3  ;;  %s367_s5 = sadd.s32 3, %s1063_s8 }
  0x3f   : > { %s1079_s29 = sld [smem:[#allocation6 + %s333_s11]]  ;;  %vm313_vm4 = vcmp.eq.s32.totalorder %v1069_v2, 0  ;;  %vm330_vm5 = vcmp.eq.s32.totalorder %v1069_v2, 1  ;;  %vm347_vm6 = vcmp.eq.s32.totalorder %v1069_v2, 2  ;;  %vm380_vm7 = vcmp.eq.s32.totalorder %v1065_v1, 4  ;;  %s384_s12 = sadd.s32 4, %s1063_s8 }
  0x40   : > { %s1084_s22 = sld [smem:[#allocation2 + %s350_s27]]  ;;  %vm364_vm8 = vcmp.eq.s32.totalorder %v1069_v2, 3  ;;  %vm314_vm10 = vcmp.eq.s32.totalorder %v1072_v3, 0  ;;  %vm331_vm11 = vcmp.eq.s32.totalorder %v1072_v3, 1  ;;  %vm348_vm12 = vcmp.eq.s32.totalorder %v1072_v3, 2  ;;  %s401_s30 = sadd.s32 5, %s1063_s8 }
  0x41   : > { %s1091_s24 = sld [smem:[#allocation6 + %s350_s27]]  ;;  %vm365_vm13 = vcmp.eq.s32.totalorder %v1072_v3, 3  ;;  %vm397_vm15 = vcmp.eq.s32.totalorder %v1065_v1, 5  ;;  %vm399_vm14 = vcmp.eq.s32.totalorder %v1072_v3, 5  ;;  %vm315_vm9 = vcmp.eq.s32.totalorder %v1082_v4, 0  ;;  %s605_s11 = sshll.u32 %s874_s18, 5 }
  0x42   : > { %v1098_v5 = vstv %s317_s9  ;;  %s1100_s7 = sld [smem:[#allocation2 + %s367_s5]]  ;;  %s444_s18 = scalar_lea.hbm %s1267_s4, %s605_s11 }
  0x43   : > { %v319_v6 = vsel %vm312_vm0, %v1098_v5, 0.0  ;;  %v1109_v7 = vstv %s323_s14  ;;  %s1111_s1 = sld [smem:[#allocation6 + %s367_s5]]  ;;  %v320_v8 = vsel %vm313_vm4, %v1098_v5, 0.0  ;;  %v321_v9 = vsel %vm314_vm10, %v1098_v5, 0.0  ;;  %s304_s27 = scalar_lea.vmem [#allocation11], %s596_s23 }
  0x44   : > { %v325_v10 = vsel %vm312_vm0, %v1109_v7, 0.0  ;;  %v1126_v11 = vstv %s1074_s25  ;;  %s385_s2 = sld [smem:[#allocation2 + %s384_s12]]  ;;  %v326_v12 = vsel %vm313_vm4, %v1109_v7, 0.0  ;;  %v327_v13 = vsel %vm314_vm10, %v1109_v7, 0.0  ;;  %s431_s23 = scalar_lea.sflag [#allocation4], %s1044_s0 }
  0x45   : > { %v336_v14 = vsel %vm329_vm1, %v1126_v11, %v319_v6  ;;  %v341_v15 = vstv %s1079_s29  ;;  %s391_s21 = sld [smem:[#allocation6 + %s384_s12]]  ;;  %v337_v16 = vsel %vm330_vm5, %v1126_v11, %v320_v8  ;;  %v338_v17 = vsel %vm331_vm11, %v1126_v11, %v321_v9  ;;  %s445_s29 = sshll.u32 %s304_s27, 4  ;;  %v417_v8 = vld [vmem:[%s1056_s6 + $0x18] sm:$0xff]  ;;  %s446_s29 = int_to_ptr.vmem [resolvable:$true] %s445_s29 }
  0x46   : > { %v342_v18 = vsel %vm329_vm1, %v341_v15, %v325_v10  ;;  %v352_v19 = vstv %s1084_s22  ;;  %s402_s8 = sld [smem:[#allocation2 + %s401_s30]]  ;;  %v343_v20 = vsel %vm330_vm5, %v341_v15, %v326_v12  ;;  %v344_v21 = vsel %vm331_vm11, %v341_v15, %v327_v13  ;;  %s447_s22 = sshll.u32 %s444_s18, 4  ;;  %s448_s22 = int_to_ptr.hbm [resolvable:$true] %s447_s22 }
  0x47   : > { %v353_v22 = vsel %vm346_vm2, %v352_v19, %v336_v14  ;;  %v358_v23 = vstv %s1091_s24  ;;  %s408_s9 = sld [smem:[#allocation6 + %s401_s30]]  ;;  %v354_v24 = vsel %vm347_vm6, %v352_v19, %v337_v16  ;;  %v355_v25 = vsel %vm348_vm12, %v352_v19, %v338_v17  ;;  %s802_s5 = sshra.s32 %s448_s22, 4  ;;  %s803_s5 = int_to_ptr.hbm [resolvable:$true] %s802_s5 }
  0x48   : > { %v359_v26 = vsel %vm346_vm2, %v358_v23, %v342_v18  ;;  %v369_v27 = vstv %s1100_s7  ;;  %v360_v28 = vsel %vm347_vm6, %v358_v23, %v343_v20  ;;  %v361_v29 = vsel %vm348_vm12, %v358_v23, %v344_v21  ;;  %s804_s24 = scalar_lea.hbm %s803_s5, 32  ;;  %s808_s12 = scalar_lea.hbm %s1267_s4, 96 }
  0x49   : > { %v370_v30 = vsel %vm363_vm3, %v369_v27, %v353_v22  ;;  %v375_v31 = vstv %s1111_s1  ;;  %v371_v32 = vsel %vm364_vm8, %v369_v27, %v354_v24  ;;  %v372_v33 = vsel %vm365_vm13, %v369_v27, %v355_v25  ;;  %p805_p1 = scmp.ne.s32.totalorder %s803_s5, %s804_s24  ;;  %p809_p9 = scmp.lt.s32.totalorder %s803_s5, %s1267_s4 }
  0x4a   : > { %v376_v34 = vsel %vm363_vm3, %v375_v31, %v359_v26  ;;  %v386_v35 = vstv %s385_s2  ;;  %v377_v36 = vsel %vm364_vm8, %v375_v31, %v360_v28  ;;  %v378_v37 = vsel %vm365_vm13, %v375_v31, %v361_v29  ;;  %p810_p10 = scmp.lt.s32.totalorder %s808_s12, %s804_s24 }
  0x4b   : > { %v387_v38 = vsel %vm380_vm7, %v386_v35, %v370_v30  ;;  %v392_v39 = vstv %s391_s21  ;;  %vm1282_vm0 = vcmp.eq.s32.totalorder %v1069_v2, 4  ;;  %vm1283_vm1 = vcmp.eq.s32.totalorder %v1072_v3, 4  ;;  %p806_p4 = pnand %p805_p1, %p997_p5 }
  0x4c   : > { %v388_v40 = vsel %vm1282_vm0, %v386_v35, %v371_v32  ;;  %v389_v41 = vsel %vm1283_vm1, %v386_v35, %v372_v33  ;;  %v393_v42 = vsel %vm380_vm7, %v392_v39, %v376_v34  ;;  %v403_v43 = vstv %s402_s8  ;;  %vm1284_vm2 = vmmov %vm1282_vm0  ;;  %p811_p11 = por %p810_p10, %p809_p9 }
  0x4d   : > { %v394_v45 = vsel %vm1284_vm2, %v392_v39, %v377_v36  ;;  %vm1285_vm3 = vmmov %vm1283_vm1  ;;  %v404_v49 = vsel %vm397_vm15, %v403_v43, %v387_v38  ;;  %v409_v50 = vstv %s408_s9  ;;  %vm1286_vm4 = vcmp.eq.s32.totalorder %v1069_v2, 5  ;;  %p807_p8 = pneg %p806_p4 }
  0x4e   : > { %v395_v47 = vsel %vm1285_vm3, %v392_v39, %v378_v37  ;;  %v405_v51 = vsel %vm1286_vm4, %v403_v43, %v388_v40  ;;  %v406_v52 = vsel %vm399_vm14, %v403_v43, %v389_v41  ;;  %v410_v53 = vsel %vm397_vm15, %v409_v50, %v393_v42  ;;  %vm1287_vm5 = vmmov %vm1286_vm4 }
  0x4f   : > { %v411_v54 = vsel %vm1287_vm5, %v409_v50, %v394_v45  ;;  %v412_v55 = vsel %vm399_vm14, %v409_v50, %v395_v47  ;;  %v322_v56 = vsel %vm315_vm9, %v1098_v5, 0.0  ;;  %v418_v57 = vmul.f32 %v414_v44, %v410_v53  ;;  %p812_p12 = pnand %p811_p11, %p807_p8 }
  0x50   : > { %v419_v58 = vmul.f32 %v415_v46, %v411_v54  ;;  %v420_v59 = vmul.f32 %v416_v48, %v412_v55  ;;  %v328_v60 = vsel %vm315_vm9, %v1109_v7, 0.0  ;;  %vm332_vm6 = vcmp.eq.s32.totalorder %v1082_v4, 1 }
  0x51   : > { %vm349_vm7 = vcmp.eq.s32.totalorder %v1082_v4, 2  ;;  %vm366_vm8 = vcmp.eq.s32.totalorder %v1082_v4, 3  ;;  %v422_v61 = vadd.f32 %v418_v57, %v404_v49  ;;  %v339_v0 = vsel %vm332_vm6, %v1126_v11, %v322_v56 }
  0x52   : > { %v423_v62 = vadd.f32 %v419_v58, %v405_v51  ;;  %v424_v63 = vadd.f32 %v420_v59, %v406_v52  ;;  %v345_v1 = vsel %vm332_vm6, %v341_v15, %v328_v60  ;;  %v356_v2 = vsel %vm349_vm7, %v352_v19, %v339_v0 }
  0x53   : > { %vm383_vm10 = vcmp.eq.s32.totalorder %v1082_v4, 4  ;;  %426 = vst [vmem:[%s304_s27] sm:$0xff] %v422_v61  ;;  %v362_v3 = vsel %vm349_vm7, %v358_v23, %v345_v1  ;;  %v373_v5 = vsel %vm366_vm8, %v369_v27, %v356_v2  ;;  %vm400_vm9 = vcmp.eq.s32.totalorder %v1082_v4, 5 }
  0x54   : > { %427 = vst [vmem:[%s304_s27 + $0x8] sm:$0xff] %v423_v62  ;;  %v379_v6 = vsel %vm366_vm8, %v375_v31, %v362_v3  ;;  %v390_v7 = vsel %vm383_vm10, %v386_v35, %v373_v5 }
  0x55   : > { %428 = vst [vmem:[%s304_s27 + $0x10] sm:$0xff] %v424_v63  ;;  %v396_v9 = vsel %vm383_vm10, %v392_v39, %v379_v6  ;;  %v407_v10 = vsel %vm400_vm9, %v403_v43, %v390_v7 }
  0x56   : > { %v413_v11 = vsel %vm400_vm9, %v409_v50, %v396_v9 }
  0x57   : > { %v421_v12 = vmul.f32 %v417_v8, %v413_v11 }
  0x59   : > { %v425_v13 = vadd.f32 %v421_v12, %v407_v10 }
  0x5b   : > { %429 = vst [vmem:[%s304_s27 + $0x18] sm:$0xff] %v425_v13 }
  0x5c   : > { %815 = shalt.err (!%p812_p12)
}
  0x5d   : > { %s888_s0 = smov 128   ;;  %s889_s30 = smov 8  }
  0x5e   : > { %618 = dma.vmem_to_hbm [thread:$0]  (%p997_p5), %s446_s29, 512, %s448_s22, %s431_s23, %s888_s0, %s888_s0, %s889_s30  }
  0x5f PF: > { %p643_p13 = scmp.ge.s32.totalorder %s882_s20, 2  ;;  %s462_s21 = sand.u32 1, %s862_s15  }
  0x60   : > { %s463_s8 = scalar_lea.sflag [#allocation4], %s462_s21 }
  0x61   : > { %p635_p0 = pnand %p643_p13, %p964_p6 }
  0x63   : > { %p636_p3 = pneg %p635_p0 }
  0x65   : > { %857 = dma.done.wait (%p636_p3), %s463_s8, 512  }
  0x66   : > { %859 = vsyncadd (%p636_p3), %s463_s8, 4294966784  ;;  %s25_s20 = sadd.s32 1, %s882_s20   ;;  %s1288_s15 = smov %s866_s16 }
  0x67   : > { %p22_p7 = scmp.ge.s32.totalorder %s25_s20, 5   ;;  %s1289_s16 = smov %s870_s17 }
  0x68   : > { %s1290_s17 = smov %s1009_s28  ;;  %s1291_s18 = smov %s878_s19 }
  0x69   : > { %s1292_s19 = smov %s1294_s10  ;;  %24 = sbr.rel (!%p22_p7) target bundleno = 14 (0xe), region = 103 }
  0x6e   :  { %469 = vsyncpa [#allocation3], 1 }
  0x6f   :  { %471 = vsyncpa [#allocation3 + $0x1], 1 }
  0x70   :  { %472 = vsyncpa [#allocation10], 1 }
  0x71   :  { %474 = vsyncpa [#allocation10 + $0x1], 1 }
  0x72   :  { %475 = vsyncpa [#allocation4], 1 }
  0x73   :  { %477 = vsyncpa [#allocation4 + $0x1], 1 }
  0x74   :  { %478 = vsyncpa [#allocation5], 1 }
  0x75   :  { %480 = vsyncpa [#allocation5 + $0x1], 1 }
  0x76   :  { %481 = vsyncpa [#allocation7], 1 }

</bundles_post_ra>
